<compile_context>
chip_gen: v5e
topology: v5e:2x2
jax: 0.10.0
libtpu: 0.0.40
codegen_flags: <defaults>
</compile_context>

<pallas_src>
import functools

import jax
import jax.numpy as jnp
from jax.experimental import pallas as pl
from jax.experimental.pallas import tpu as pltpu

_LANES = 128
_SUBLANES = 8
_DEFAULT_BLOCK_ROWS = 2048  # (2048, 128) f32 = 1 MiB per input per buffer


def _tanimoto_dual_kernel(
    x_ref, t_ref, o_ref, sp_acc, sq_acc, sx_acc, st_acc,
    *, n_elems, valid_rows, block_rows, smooth, mask_tail,
):
    step = pl.program_id(0)

    @pl.when(step == 0)
    def _():
        sp_acc[...] = jnp.zeros_like(sp_acc)
        sq_acc[...] = jnp.zeros_like(sq_acc)
        sx_acc[...] = jnp.zeros_like(sx_acc)
        st_acc[...] = jnp.zeros_like(st_acc)

    x = x_ref[...].astype(jnp.float32)
    t = t_ref[...].astype(jnp.float32)

    if mask_tail:
        # Final grid block may extend past the array; those rows are undefined
        # garbage and must be zeroed before accumulating.
        row = jax.lax.broadcasted_iota(jnp.int32, x.shape, 0) + step * block_rows
        keep = row < valid_rows
        x = jnp.where(keep, x, 0.0)
        t = jnp.where(keep, t, 0.0)

    groups = block_rows // _SUBLANES

    def partial_sum(v):
        # (block_rows, 128) -> (groups, 8, 128) is layout-preserving; the
        # axis-0 sum is pure cross-vreg VPU adds (no XLU in the hot loop).
        return jnp.sum(v.reshape(groups, _SUBLANES, _LANES), axis=0)

    sp_acc[...] += partial_sum(x * t)
    sq_acc[...] += partial_sum(x * x + t * t)
    sx_acc[...] += partial_sum(x)
    st_acc[...] += partial_sum(t)

    @pl.when(step == pl.num_programs(0) - 1)
    def _():
        sp = jnp.sum(sp_acc[...])
        sq = jnp.sum(sq_acc[...])
        sx = jnp.sum(sx_acc[...])
        st = jnp.sum(st_acc[...])
        # TODO(synk): for > ~16.7M elements, float32(n) is not exact; the
        # resulting perturbation of the complement branch is negligible.
        n = jnp.float32(n_elems)
        sm = jnp.float32(smooth)

        # branch 1: (x, t)
        t1 = 1.0 - (sp + sm) / (sq - sp + sm)
        # branch 2: (1-x, 1-t), via the same sums and the true element count
        sp_c = n - sx - st + sp
        sq_c = 2.0 * n - 2.0 * (sx + st) + sq
        t2 = 1.0 - (sp_c + sm) / (sq_c - sp_c + sm)

        o_ref[0, 0] = 0.5 * (t1 + t2)


def tanimoto_dual_loss(inputs, targets, smooth=1.0):
    """Pallas TPU implementation of TanimotoDualLoss.forward."""
    assert inputs.shape == targets.shape
    n_elems = int(inputs.size)

    x = inputs.reshape(-1)   # keep native dtype; kernel casts to f32
    t = targets.reshape(-1)

    # Pad (only when needed) so the flat length is a multiple of 8*128, which
    # lets us reshape to a lane-dense (rows, 128) slab with rows % 8 == 0.
    align = _SUBLANES * _LANES
    padded = int(pl.cdiv(n_elems, align)) * align
    pad = padded - n_elems
    if pad:
        x = jnp.pad(x, (0, pad))
        t = jnp.pad(t, (0, pad))

    rows = padded // _LANES
    x2d = x.reshape(rows, _LANES)
    t2d = t.reshape(rows, _LANES)

    block_rows = min(_DEFAULT_BLOCK_ROWS, rows)      # multiple of 8
    grid = (int(pl.cdiv(rows, block_rows)),)
    mask_tail = (rows % block_rows) != 0

    kernel = functools.partial(
        _tanimoto_dual_kernel,
        n_elems=n_elems,
        valid_rows=rows,
        block_rows=block_rows,
        smooth=float(smooth),
        mask_tail=mask_tail,
    )

    itemsize = jnp.dtype(inputs.dtype).itemsize
    cost = pl.CostEstimate(
        flops=8 * n_elems,
        transcendentals=0,
        bytes_accessed=2 * n_elems * itemsize,
    )

    out = pl.pallas_call(
        kernel,
        out_shape=jax.ShapeDtypeStruct((1, 1), jnp.float32),
        grid_spec=pltpu.PrefetchScalarGridSpec(
            num_scalar_prefetch=0,
            grid=grid,
            in_specs=[
                pl.BlockSpec((block_rows, _LANES), lambda i: (i, 0)),
                pl.BlockSpec((block_rows, _LANES), lambda i: (i, 0)),
            ],
            out_specs=pl.BlockSpec(
                (1, 1), lambda i: (0, 0), memory_space=pltpu.MemorySpace.SMEM
            ),
            scratch_shapes=[
                pltpu.VMEM((_SUBLANES, _LANES), jnp.float32),  # sum(x*t)
                pltpu.VMEM((_SUBLANES, _LANES), jnp.float32),  # sum(x^2+t^2)
                pltpu.VMEM((_SUBLANES, _LANES), jnp.float32),  # sum(x)
                pltpu.VMEM((_SUBLANES, _LANES), jnp.float32),  # sum(t)
            ],
        ),
        compiler_params=pltpu.CompilerParams(
            dimension_semantics=("arbitrary",)
        ),
        cost_estimate=cost,
    )(x2d, t2d)

    return out[0, 0]


def tanimoto_dual_loss_ref(inputs, targets, smooth=1.0):
    """Pure-JAX reference matching the PyTorch module exactly."""

    def tanimoto(x, t):
        x = x.reshape(-1).astype(jnp.float32)
        t = t.reshape(-1).astype(jnp.float32)
        sp = jnp.sum(x * t)
        denom = jnp.sum(x * x + t * t) - sp
        return 1.0 - (sp + smooth) / (denom + smooth)

    t1 = tanimoto(inputs, targets)
    t2 = tanimoto(1.0 - inputs, 1.0 - targets)
    return (t1 + t2) / 2.0


if __name__ == "__main__":
    key = jax.random.PRNGKey(0)
    k1, k2 = jax.random.split(key)

    # NCHW, e.g. sigmoid-style probabilities vs binary masks
    shape = (2, 4, 16, 16)
    inputs = jax.nn.sigmoid(jax.random.normal(k1, shape, dtype=jnp.float32))
    targets = (jax.random.uniform(k2, shape) > 0.5).astype(jnp.float32)

    loss = jax.block_until_ready(tanimoto_dual_loss(inputs, targets, smooth=1.0))
    ref = jax.block_until_ready(tanimoto_dual_loss_ref(inputs, targets, smooth=1.0))
    assert jnp.allclose(loss, ref, rtol=1e-5, atol=1e-5), (loss, ref)

    # Extra check: ragged size that exercises the in-kernel tail mask and
    # multi-step accumulation path (still small).
    shape2 = (3, 5, 17, 13)  # 3315 elements -> padded, masked tail block
    a = jax.nn.sigmoid(jax.random.normal(k1, shape2, dtype=jnp.float32))
    b = jax.nn.sigmoid(jax.random.normal(k2, shape2, dtype=jnp.float32))
    loss2 = jax.block_until_ready(tanimoto_dual_loss(a, b, smooth=1.0))
    ref2 = jax.block_until_ready(tanimoto_dual_loss_ref(a, b, smooth=1.0))
    assert jnp.allclose(loss2, ref2, rtol=1e-5, atol=1e-5), (loss2, ref2)

    print("KERNEL_OK")
</pallas_src>

<mosaic_0001>
module attributes {stable_mosaic.version = 11 : i64} {
  func.func @_tanimoto_dual_kernel(%arg0: i32, %arg1: memref<16x128xf32, #tpu.memory_space<vmem>>, %arg2: memref<16x128xf32, #tpu.memory_space<vmem>>, %arg3: memref<1x1xf32, #tpu.memory_space<smem>>, %arg4: memref<8x128xf32, #tpu.memory_space<vmem>>, %arg5: memref<8x128xf32, #tpu.memory_space<vmem>>, %arg6: memref<8x128xf32, #tpu.memory_space<vmem>>, %arg7: memref<8x128xf32, #tpu.memory_space<vmem>>) attributes {dimension_semantics = [#tpu.dimension_semantics<arbitrary>], iteration_bounds = array<i64: 1>, scalar_prefetch = 0 : i64, scratch_operands = 4 : i64, tpu.core_type = #tpu.core_type<tc>, window_params = [{transform_indices = @transform_0, window_bounds = array<i64: 16, 128>}, {transform_indices = @transform_1, window_bounds = array<i64: 16, 128>}, {transform_indices = @transform_2, window_bounds = array<i64: 1, 1>}]} {
    %c0_i32 = arith.constant 0 : i32
    %0 = arith.cmpi eq, %arg0, %c0_i32 : i32
    %1 = arith.extui %0 : i1 to i32
    %c0_i32_0 = arith.constant 0 : i32
    %2 = arith.cmpi ne, %1, %c0_i32_0 : i32
    scf.if %2 {
      %cst_25 = arith.constant 0.000000e+00 : f32
      %32 = vector.broadcast %cst_25 : f32 to vector<8x128xf32>
      %c0_26 = arith.constant 0 : index
      %c0_27 = arith.constant 0 : index
      %33 = vector.load %arg4[%c0_26, %c0_27] : memref<8x128xf32, #tpu.memory_space<vmem>>, vector<8x128xf32>
      tpu.vector_store %arg4[%c0_26, %c0_27], %32 {strides = array<i32>} : memref<8x128xf32, #tpu.memory_space<vmem>>, vector<8x128xf32>,
      %cst_28 = arith.constant 0.000000e+00 : f32
      %34 = vector.broadcast %cst_28 : f32 to vector<8x128xf32>
      %c0_29 = arith.constant 0 : index
      %c0_30 = arith.constant 0 : index
      %35 = vector.load %arg5[%c0_29, %c0_30] : memref<8x128xf32, #tpu.memory_space<vmem>>, vector<8x128xf32>
      tpu.vector_store %arg5[%c0_29, %c0_30], %34 {strides = array<i32>} : memref<8x128xf32, #tpu.memory_space<vmem>>, vector<8x128xf32>,
      %cst_31 = arith.constant 0.000000e+00 : f32
      %36 = vector.broadcast %cst_31 : f32 to vector<8x128xf32>
      %c0_32 = arith.constant 0 : index
      %c0_33 = arith.constant 0 : index
      %37 = vector.load %arg6[%c0_32, %c0_33] : memref<8x128xf32, #tpu.memory_space<vmem>>, vector<8x128xf32>
      tpu.vector_store %arg6[%c0_32, %c0_33], %36 {strides = array<i32>} : memref<8x128xf32, #tpu.memory_space<vmem>>, vector<8x128xf32>,
      %cst_34 = arith.constant 0.000000e+00 : f32
      %38 = vector.broadcast %cst_34 : f32 to vector<8x128xf32>
      %c0_35 = arith.constant 0 : index
      %c0_36 = arith.constant 0 : index
      %39 = vector.load %arg7[%c0_35, %c0_36] : memref<8x128xf32, #tpu.memory_space<vmem>>, vector<8x128xf32>
      tpu.vector_store %arg7[%c0_35, %c0_36], %38 {strides = array<i32>} : memref<8x128xf32, #tpu.memory_space<vmem>>, vector<8x128xf32>,
    } else {
    }
    %c0 = arith.constant 0 : index
    %c0_1 = arith.constant 0 : index
    %3 = vector.load %arg1[%c0, %c0_1] : memref<16x128xf32, #tpu.memory_space<vmem>>, vector<16x128xf32>
    %c0_2 = arith.constant 0 : index
    %c0_3 = arith.constant 0 : index
    %4 = vector.load %arg2[%c0_2, %c0_3] : memref<16x128xf32, #tpu.memory_space<vmem>>, vector<16x128xf32>
    %c0_4 = arith.constant 0 : index
    %c0_5 = arith.constant 0 : index
    %5 = vector.load %arg4[%c0_4, %c0_5] : memref<8x128xf32, #tpu.memory_space<vmem>>, vector<8x128xf32>
    %6 = arith.mulf %3, %4 : vector<16x128xf32>
    %7 = vector.shape_cast %6 : vector<16x128xf32> to vector<2x8x128xf32>
    %cst = arith.constant dense<0.000000e+00> : vector<8x128xf32>
    %8 = vector.multi_reduction <add>, %7, %cst [0] : vector<2x8x128xf32> to vector<8x128xf32>
    %9 = arith.addf %5, %8 : vector<8x128xf32>
    %c0_6 = arith.constant 0 : index
    %c0_7 = arith.constant 0 : index
    %10 = vector.load %arg4[%c0_6, %c0_7] : memref<8x128xf32, #tpu.memory_space<vmem>>, vector<8x128xf32>
    tpu.vector_store %arg4[%c0_6, %c0_7], %9 {strides = array<i32>} : memref<8x128xf32, #tpu.memory_space<vmem>>, vector<8x128xf32>,
    %c0_8 = arith.constant 0 : index
    %c0_9 = arith.constant 0 : index
    %11 = vector.load %arg5[%c0_8, %c0_9] : memref<8x128xf32, #tpu.memory_space<vmem>>, vector<8x128xf32>
    %12 = arith.mulf %3, %3 : vector<16x128xf32>
    %13 = arith.mulf %4, %4 : vector<16x128xf32>
    %14 = arith.addf %12, %13 : vector<16x128xf32>
    %15 = vector.shape_cast %14 : vector<16x128xf32> to vector<2x8x128xf32>
    %cst_10 = arith.constant dense<0.000000e+00> : vector<8x128xf32>
    %16 = vector.multi_reduction <add>, %15, %cst_10 [0] : vector<2x8x128xf32> to vector<8x128xf32>
    %17 = arith.addf %11, %16 : vector<8x128xf32>
    %c0_11 = arith.constant 0 : index
    %c0_12 = arith.constant 0 : index
    %18 = vector.load %arg5[%c0_11, %c0_12] : memref<8x128xf32, #tpu.memory_space<vmem>>, vector<8x128xf32>
    tpu.vector_store %arg5[%c0_11, %c0_12], %17 {strides = array<i32>} : memref<8x128xf32, #tpu.memory_space<vmem>>, vector<8x128xf32>,
    %c0_13 = arith.constant 0 : index
    %c0_14 = arith.constant 0 : index
    %19 = vector.load %arg6[%c0_13, %c0_14] : memref<8x128xf32, #tpu.memory_space<vmem>>, vector<8x128xf32>
    %20 = vector.shape_cast %3 : vector<16x128xf32> to vector<2x8x128xf32>
    %cst_15 = arith.constant dense<0.000000e+00> : vector<8x128xf32>
    %21 = vector.multi_reduction <add>, %20, %cst_15 [0] : vector<2x8x128xf32> to vector<8x128xf32>
    %22 = arith.addf %19, %21 : vector<8x128xf32>
    %c0_16 = arith.constant 0 : index
    %c0_17 = arith.constant 0 : index
    %23 = vector.load %arg6[%c0_16, %c0_17] : memref<8x128xf32, #tpu.memory_space<vmem>>, vector<8x128xf32>
    tpu.vector_store %arg6[%c0_16, %c0_17], %22 {strides = array<i32>} : memref<8x128xf32, #tpu.memory_space<vmem>>, vector<8x128xf32>,
    %c0_18 = arith.constant 0 : index
    %c0_19 = arith.constant 0 : index
    %24 = vector.load %arg7[%c0_18, %c0_19] : memref<8x128xf32, #tpu.memory_space<vmem>>, vector<8x128xf32>
    %25 = vector.shape_cast %4 : vector<16x128xf32> to vector<2x8x128xf32>
    %cst_20 = arith.constant dense<0.000000e+00> : vector<8x128xf32>
    %26 = vector.multi_reduction <add>, %25, %cst_20 [0] : vector<2x8x128xf32> to vector<8x128xf32>
    %27 = arith.addf %24, %26 : vector<8x128xf32>
    %c0_21 = arith.constant 0 : index
    %c0_22 = arith.constant 0 : index
    %28 = vector.load %arg7[%c0_21, %c0_22] : memref<8x128xf32, #tpu.memory_space<vmem>>, vector<8x128xf32>
    tpu.vector_store %arg7[%c0_21, %c0_22], %27 {strides = array<i32>} : memref<8x128xf32, #tpu.memory_space<vmem>>, vector<8x128xf32>,
    %c0_i32_23 = arith.constant 0 : i32
    %29 = arith.cmpi eq, %arg0, %c0_i32_23 : i32
    %30 = arith.extui %29 : i1 to i32
    %c0_i32_24 = arith.constant 0 : i32
    %31 = arith.cmpi ne, %30, %c0_i32_24 : i32
    scf.if %31 {
      %c0_25 = arith.constant 0 : index
      %c0_26 = arith.constant 0 : index
      %32 = vector.load %arg4[%c0_25, %c0_26] : memref<8x128xf32, #tpu.memory_space<vmem>>, vector<8x128xf32>
      %33 = vector.shape_cast %32 : vector<8x128xf32> to vector<1x8x128xf32>
      %cst_27 = arith.constant dense<0.000000e+00> : vector<1xf32>
      %34 = vector.multi_reduction <add>, %33, %cst_27 [1, 2] : vector<1x8x128xf32> to vector<1xf32>
      %35 = vector.shape_cast %34 : vector<1xf32> to vector<1x1x1xf32>
      %36 = vector.extract %35[0, 0, 0] : f32 from vector<1x1x1xf32>
      %c0_28 = arith.constant 0 : index
      %c0_29 = arith.constant 0 : index
      %37 = vector.load %arg5[%c0_28, %c0_29] : memref<8x128xf32, #tpu.memory_space<vmem>>, vector<8x128xf32>
      %38 = vector.shape_cast %37 : vector<8x128xf32> to vector<1x8x128xf32>
      %cst_30 = arith.constant dense<0.000000e+00> : vector<1xf32>
      %39 = vector.multi_reduction <add>, %38, %cst_30 [1, 2] : vector<1x8x128xf32> to vector<1xf32>
      %40 = vector.shape_cast %39 : vector<1xf32> to vector<1x1x1xf32>
      %41 = vector.extract %40[0, 0, 0] : f32 from vector<1x1x1xf32>
      %c0_31 = arith.constant 0 : index
      %c0_32 = arith.constant 0 : index
      %42 = vector.load %arg6[%c0_31, %c0_32] : memref<8x128xf32, #tpu.memory_space<vmem>>, vector<8x128xf32>
      %43 = vector.shape_cast %42 : vector<8x128xf32> to vector<1x8x128xf32>
      %cst_33 = arith.constant dense<0.000000e+00> : vector<1xf32>
      %44 = vector.multi_reduction <add>, %43, %cst_33 [1, 2] : vector<1x8x128xf32> to vector<1xf32>
      %45 = vector.shape_cast %44 : vector<1xf32> to vector<1x1x1xf32>
      %46 = vector.extract %45[0, 0, 0] : f32 from vector<1x1x1xf32>
      %c0_34 = arith.constant 0 : index
      %c0_35 = arith.constant 0 : index
      %47 = vector.load %arg7[%c0_34, %c0_35] : memref<8x128xf32, #tpu.memory_space<vmem>>, vector<8x128xf32>
      %48 = vector.shape_cast %47 : vector<8x128xf32> to vector<1x8x128xf32>
      %cst_36 = arith.constant dense<0.000000e+00> : vector<1xf32>
      %49 = vector.multi_reduction <add>, %48, %cst_36 [1, 2] : vector<1x8x128xf32> to vector<1xf32>
      %50 = vector.shape_cast %49 : vector<1xf32> to vector<1x1x1xf32>
      %51 = vector.extract %50[0, 0, 0] : f32 from vector<1x1x1xf32>
      %cst_37 = arith.constant 1.000000e+00 : f32
      %52 = arith.addf %36, %cst_37 : f32
      %53 = arith.subf %41, %36 : f32
      %cst_38 = arith.constant 1.000000e+00 : f32
      %54 = arith.addf %53, %cst_38 : f32
      %55 = arith.divf %52, %54 : f32
      %cst_39 = arith.constant 1.000000e+00 : f32
      %56 = arith.subf %cst_39, %55 : f32
      %cst_40 = arith.constant 2.048000e+03 : f32
      %57 = arith.subf %cst_40, %46 : f32
      %58 = arith.subf %57, %51 : f32
      %59 = arith.addf %58, %36 : f32
      %cst_41 = arith.constant 2.000000e+00 : f32
      %cst_42 = arith.constant 2.048000e+03 : f32
      %60 = arith.mulf %cst_41, %cst_42 : f32
      %61 = arith.addf %46, %51 : f32
      %cst_43 = arith.constant 2.000000e+00 : f32
      %62 = arith.mulf %cst_43, %61 : f32
      %63 = arith.subf %60, %62 : f32
      %64 = arith.addf %63, %41 : f32
      %cst_44 = arith.constant 1.000000e+00 : f32
      %65 = arith.addf %59, %cst_44 : f32
      %66 = arith.subf %64, %59 : f32
      %cst_45 = arith.constant 1.000000e+00 : f32
      %67 = arith.addf %66, %cst_45 : f32
      %68 = arith.divf %65, %67 : f32
      %cst_46 = arith.constant 1.000000e+00 : f32
      %69 = arith.subf %cst_46, %68 : f32
      %70 = arith.addf %56, %69 : f32
      %cst_47 = arith.constant 5.000000e-01 : f32
      %71 = arith.mulf %cst_47, %70 : f32
      %c0_48 = arith.constant 0 : index
      %c0_49 = arith.constant 0 : index
      %72 = memref.load %arg3[%c0_48, %c0_49] : memref<1x1xf32, #tpu.memory_space<smem>>
      memref.store %71, %arg3[%c0_48, %c0_49] : memref<1x1xf32, #tpu.memory_space<smem>>
    } else {
    }
    return
  }
  func.func @transform_0(%arg0: i32) -> (i32, i32) {
    %c0_i32 = arith.constant 0 : i32
    %c0_i32_0 = arith.constant 0 : i32
    return %arg0, %c0_i32 : i32, i32
  }
  func.func @transform_1(%arg0: i32) -> (i32, i32) {
    %c0_i32 = arith.constant 0 : i32
    %c0_i32_0 = arith.constant 0 : i32
    return %arg0, %c0_i32 : i32, i32
  }
  func.func @transform_2(%arg0: i32) -> (i32, i32) {
    %c0_i32 = arith.constant 0 : i32
    %c0_i32_0 = arith.constant 0 : i32
    %c0_i32_1 = arith.constant 0 : i32
    return %c0_i32, %c0_i32_0 : i32, i32
  }
}

</mosaic_0001>

<bundles_post_ra>
// kernel: tpu_custom_call.1
= control target key start
LH: loop header
LB: loop body
LE: loop exit
PB: predicated region body
PF: predicated region fallthrough
CT: control target
= control target key end

     0   :  { %7 = vsyncpa [#allocation7], 0  ;;  %s318_s0 = inlined_call_operand.hbm [shape: f32[16,128], index: 0, kind: input, shape index: {}]   ;;  %s319_s1 = inlined_call_operand.hbm [shape: f32[16,128], index: 1, kind: input, shape index: {}]   ;;  %s320_s2 = inlined_call_operand.hbm [shape: f32[1,1], index: 2, kind: output, shape index: {}]  }
   0x1   :  { %8 = vsyncpa [#allocation10], 0 }
   0x2   :  { %9 = vsyncpa [#allocation8], 0  ;;  %s14_s11 = sshll.u32 %s318_s0, 4  ;;  %s280_s12 = smov [#allocation6]   ;;  %s15_s11 = int_to_ptr.hbm [resolvable:$true] %s14_s11 }
   0x3   :  { %s16_s13 = sshll.u32 %s280_s12, 4  ;;  %s27_s16 = sshll.u32 %s319_s1, 4  ;;  %s17_s13 = int_to_ptr.vmem [resolvable:$true] %s16_s13  ;;  %s28_s16 = int_to_ptr.hbm [resolvable:$true] %s27_s16 }
   0x4   :  { %s281_s17 = smov 128   ;;  %s282_s18 = smov 8  }
   0x5   :  { %22 = dma.hbm_to_vmem [thread:$0]  %s15_s11, 256, %s17_s13, [#allocation7], %s281_s17, %s281_s17, %s282_s18  }
   0x6   :  { %s283_s19 = smov [#allocation9]  }
   0x7   :  { %s29_s20 = sshll.u32 %s283_s19, 4  ;;  %s30_s20 = int_to_ptr.vmem [resolvable:$true] %s29_s20 }
   0x8   :  { %35 = dma.hbm_to_vmem [thread:$0]  %s28_s16, 256, %s30_s20, [#allocation10], %s281_s17, %s281_s17, %s282_s18  }
   0x9   :  { %274 = dma.done.wait [#allocation7], 256  }
   0xa   :  { %275 = vsyncadd [#allocation7], 4294967040 }
   0xb   :  { %276 = dma.done.wait [#allocation10], 256  }
   0xc   :  { %277 = vsyncadd [#allocation10], 4294967040  ;;  %v52_v0 = vld [vmem:[#allocation6] sm:$0xff]  ;;  %v53_v1 = vld [vmem:[#allocation6 + $0x8] sm:$0xff]  ;;  %s181_s16 = sshll.u32 %s320_s2, 4  ;;  %s284_s19 = smov [#allocation11]   ;;  %s182_s16 = int_to_ptr.hbm [resolvable:$true] %s181_s16 }
   0xd   :  { %v54_v2 = vld [vmem:[#allocation9] sm:$0xff]  ;;  %v64_v3 = vmul.f32 %v53_v1, %v53_v1  ;;  %v73_v4 = vadd.f32 %v53_v1, %v52_v0  ;;  %v55_v5 = vld [vmem:[#allocation9 + $0x8] sm:$0xff]  ;;  %v63_v7 = vmul.f32 %v52_v0, %v52_v0 }
   0xe   :  { %v57_v6 = vmul.f32 %v54_v2, %v52_v0  ;;  %v58_v8 = vmul.f32 %v55_v5, %v53_v1  ;;  %v65_v9 = vmul.f32 %v54_v2, %v54_v2  ;;  %v66_v10 = vmul.f32 %v55_v5, %v55_v5 }
   0xf   :  { %104 = vadd.xlane.f32.xlu1 %v73_v4  ;;  %v77_v14 = vadd.f32 %v55_v5, %v54_v2 }
  0x10   :  { %v59_v11 = vadd.f32 %v58_v8, %v57_v6  ;;  %v67_v12 = vadd.f32 %v65_v9, %v63_v7  ;;  %v68_v13 = vadd.f32 %v66_v10, %v64_v3 }
  0x12   :  { %84 = vadd.xlane.f32.xlu0 %v59_v11  ;;  %v69_v15 = vadd.f32 %v68_v13, %v67_v12 }
  0x17   :  { %114 = vadd.xlane.f32.xlu1 %v77_v14 }
  0x1a   :  { %94 = vadd.xlane.f32.xlu0 %v69_v15 }
  0x82   :  { %v105_v16 = vpop.xlane.xlu1 %104 }
  0x83   :  { %v106_v17 = vrot.slane %v105_v16, 4 }
  0x85   :  { %v85_v18 = vpop.xlane.xlu0 %84  ;;  %v107_v21 = vadd.f32 %v106_v17, %v105_v16 }
  0x86   :  { %v86_v19 = vrot.slane %v85_v18, 4 }
  0x87   :  { %v108_v26 = vrot.slane %v107_v21, 2 }
  0x88   :  { %v87_v20 = vadd.f32 %v86_v19, %v85_v18 }
  0x89   :  { %v109_v34 = vadd.f32 %v108_v26, %v107_v21 }
  0x8a   :  { %v88_v22 = vrot.slane %v87_v20, 2  ;;  %v115_v23 = vpop.xlane.xlu1 %114 }
  0x8b   :  { %v116_v24 = vrot.slane %v115_v23, 4  ;;  %v110_v38 = vrot.slane %v109_v34, 1 }
  0x8c   :  { %v89_v25 = vadd.f32 %v88_v22, %v87_v20 }
  0x8d   :  { %v117_v27 = vadd.f32 %v116_v24, %v115_v23  ;;  %v95_v28 = vpop.xlane.xlu0 %94  ;;  %v111_v42 = vadd.f32 %v110_v38, %v109_v34 }
  0x8e   :  { %v96_v29 = vrot.slane %v95_v28, 4  ;;  %v90_v30 = vrot.slane %v89_v25, 1 }
  0x8f   :  { %v118_v31 = vrot.slane %v117_v27, 2 }
  0x90   :  { %v97_v32 = vadd.f32 %v96_v29, %v95_v28  ;;  %v91_v33 = vadd.f32 %v90_v30, %v89_v25 }
  0x91   :  { %v119_v35 = vadd.f32 %v118_v31, %v117_v27 }
  0x92   :  { %v98_v36 = vrot.slane %v97_v32, 2  ;;  %193 = vpush %v91_v33 }
  0x93   :  { %v120_v40 = vrot.slane %v119_v35, 1 }
  0x94   :  { %v99_v37 = vadd.f32 %v98_v36, %v97_v32 }
  0x95   :  { %v121_v43 = vadd.f32 %v120_v40, %v119_v35 }
  0x96   :  { %v100_v39 = vrot.slane %v99_v37, 1 }
  0x98   :  { %v101_v41 = vadd.f32 %v100_v39, %v99_v37 }
  0x9a   :  { %195 = vpush %v101_v41 }
  0x9b   :  { %197 = vpush %v111_v42 }
  0x9c   :  { %199 = vpush %v121_v43 }
  0xc3   :  { %s306_s0 = spop %193 }
  0xc4   :  { %s123_s7 = sadd.f32 1.0, %s306_s0 }
  0xcb   :  { %s196_s1 = spop %195 }
  0xcc   :  { %s124_s21 = ssub.f32 %s196_s1, %s306_s0  ;;  %s198_s22 = spop %197 }
  0xcd   :  { %s144_s23 = ssub.f32 2048.0, %s198_s22  ;;  %s200_s24 = spop %199 }
  0xce   :  { %s125_s25 = sadd.f32 1.0, %s124_s21 }
  0xcf   :  { %s147_s26 = sadd.f32 %s200_s24, %s198_s22 }
  0xd0   :  { %v126_v44 = vstv %s125_s25  ;;  %s145_s27 = ssub.f32 %s144_s23, %s200_s24 }
  0xd1   :  { %210 = vrcp.f32 %v126_v44  ;;  %s148_s28 = smul.f32 2.0, %s147_s26  ;;  %v138_v48 = vand.u32 2147483648, %v126_v44  ;;  %v136_v51 = vand.u32 2147483647, %v126_v44  ;;  %vm132_vm1 = vweird.f32 %v126_v44 }
  0xd2   :  { %s310_s30 = sadd.f32 %s306_s0, %s145_s27 }
  0xd3   :  { %s149_s29 = ssub.f32 4096.0, %s148_s28  ;;  %v139_v53 = vor.u32 1.1754944e-38, %v138_v48  ;;  %vm137_vm3 = vcmp.eq.f32.partialorder %v136_v51, 8.507059e+37 }
  0xd4   :  { %s151_s9 = sadd.f32 1.0, %s310_s30 }
  0xd5   :  { %s150_s3 = sadd.f32 %s196_s1, %s149_s29 }
  0xd7   :  { %v211_v45 = vpop.eup %210  ;;  %s152_s4 = ssub.f32 %s150_s3, %s310_s30 }
  0xd8   :  { %v128_v46 = vmul.f32 %v211_v45, %v126_v44  ;;  %vm133_vm0 = vweird.f32 %v211_v45 }
  0xd9   :  { %s153_s5 = sadd.f32 1.0, %s152_s4  ;;  %vm134_vm2 = vmor %vm132_vm1, %vm133_vm0 }
  0xda   :  { %v129_v47 = vsub.f32 1.0, %v128_v46 }
  0xdb   :  { %v154_v49 = vstv %s153_s5 }
  0xdc   :  { %v130_v50 = vmul.f32 %v211_v45, %v129_v47  ;;  %212 = vrcp.f32 %v154_v49  ;;  %v166_v59 = vand.u32 2147483648, %v154_v49  ;;  %v164_v61 = vand.u32 2147483647, %v154_v49 }
  0xdd   :  { %vm160_vm5 = vweird.f32 %v154_v49 }
  0xde   :  { %v131_v52 = vadd.f32 %v211_v45, %v130_v50  ;;  %v167_v63 = vor.u32 1.1754944e-38, %v166_v59  ;;  %vm165_vm7 = vcmp.eq.f32.partialorder %v164_v61, 8.507059e+37 }
  0xe0   :  { %v135_v54 = vsel %vm134_vm2, %v211_v45, %v131_v52 }
  0xe1   :  { %v140_v55 = vsel %vm137_vm3, %v139_v53, %v135_v54 }
  0xe2   :  { %201 = vpush %v140_v55  ;;  %v213_v56 = vpop.eup %212 }
  0xe3   :  { %v156_v57 = vmul.f32 %v213_v56, %v154_v49  ;;  %vm161_vm4 = vweird.f32 %v213_v56 }
  0xe4   :  { %vm162_vm6 = vmor %vm160_vm5, %vm161_vm4 }
  0xe5   :  { %v157_v58 = vsub.f32 1.0, %v156_v57 }
  0xe7   :  { %v158_v60 = vmul.f32 %v213_v56, %v157_v58 }
  0xe9   :  { %v159_v62 = vadd.f32 %v213_v56, %v158_v60 }
  0xeb   :  { %v163_v0 = vsel %vm162_vm6, %v213_v56, %v159_v62 }
  0xec   :  { %v168_v1 = vsel %vm165_vm7, %v167_v63, %v163_v0 }
  0xed   :  { %203 = vpush %v168_v1 }
 0x113   :  { %s202_s6 = spop %201 }
 0x114   :  { %s142_s8 = smul.f32 %s202_s6, %s123_s7 }
 0x116   :  { %s143_s12 = ssub.f32 1.0, %s142_s8 }
 0x11e   :  { %s204_s10 = spop %203 }
 0x11f   :  { %s170_s11 = smul.f32 %s204_s10, %s151_s9 }
 0x121   :  { %s171_s13 = ssub.f32 1.0, %s170_s11 }
 0x123   :  { %s172_s17 = sadd.f32 %s171_s13, %s143_s12 }
 0x125   :  { %s173_s18 = smul.f32 0.5, %s172_s17 }
 0x127   :  { %175 = sst [smem:[#allocation11]] %s173_s18 }
 0x128   :  { %184 = dma.smem_to_hbm %s284_s19, 16, %s182_s16, [#allocation8]  }
 0x129   :  { %278 = dma.done.wait [#allocation8], 16  }
 0x12a   :  { %279 = vsyncadd [#allocation8], 4294967280 }
 0x12b   :  { %189 = sfence }
 0x12c   :  { %190 = vsyncpa [#allocation7], 1 }
 0x12d   :  { %191 = vsyncpa [#allocation10], 1 }
 0x12e   :  { %192 = vsyncpa [#allocation8], 1 }

</bundles_post_ra>
